<compile_context>
chip_gen: v7x
topology: tpu7x:2x2x1
jax: 0.10.0
libtpu: 0.0.40
codegen_flags: <defaults>
</compile_context>

<pallas_src>
import jax
import jax.numpy as jnp
import numpy as np
from jax import lax
from jax.experimental import pallas as pl
from jax.experimental.pallas import tpu as pltpu

LN_EPS = 1e-5
BN_EPS = 1e-5
_INV_SQRT2 = 0.7071067811865475


# ----------------------------------------------------------------------------
# Fused kernel: conv1+bn1+relu -> conv2+bn2+avgpool -> attention -> +residual -> relu
# One grid step per batch element; everything stays in VMEM.
# ----------------------------------------------------------------------------
def _make_fused_kernel(H, W):
    HW = H * W
    P0 = W + 1  # zero pad on each side of the flattened (row-major) image

    def kernel(x_ref, w1_ref, s1_ref, sh1_ref, w2_ref, s2_ref, sh2_ref,
               g1_ref, b1_ref, wv_ref, bv_ref, g2_ref, b2_ref,
               wf1_ref, bf1_ref, wf2_ref, bf2_ref,
               o_ref, xpad_ref):
        C = x_ref.shape[1]
        x = x_ref[0]                                              # (C, HW) f32, lane-dense

        # x-coordinate masks for im2col window reads that cross a row boundary.
        xi = lax.broadcasted_iota(jnp.int32, (1, HW), 1) % W
        mask_l = xi >= 1              # tap dx = -1 is invalid at x == 0
        mask_r = xi <= W - 2          # tap dx = +1 is invalid at x == W-1

        def conv3x3(w_ref):
            # 3x3 "same" conv of the (C, HW) map currently stored (zero padded) in
            # xpad_ref, as a single (Cout, 9*Cin) x (9*Cin, HW) bf16 MXU matmul (f32 acc).
            blocks = []
            for dy in (-1, 0, 1):
                for dx in (-1, 0, 1):
                    s = dy * W + dx
                    blk = xpad_ref[:, P0 + s:P0 + s + HW]         # (C, HW) shifted window
                    if dx == -1:
                        blk = jnp.where(mask_l, blk, 0.0)
                    elif dx == 1:
                        blk = jnp.where(mask_r, blk, 0.0)
                    blocks.append(blk)
            col = jnp.concatenate(blocks, axis=0).astype(jnp.bfloat16)   # (9C, HW)
            return jnp.dot(w_ref[...], col, preferred_element_type=jnp.float32)  # (C, HW)

        # ---- conv1 + bn1 (folded) + relu --------------------------------------
        xpad_ref[...] = jnp.zeros_like(xpad_ref)
        xpad_ref[:, P0:P0 + HW] = x
        y1 = conv3x3(w1_ref)
        y1 = jnp.maximum(y1 * s1_ref[...] + sh1_ref[...], 0.0)           # (C, HW)

        # ---- conv2 + bn2 (folded) + AdaptiveAvgPool2d(1) ----------------------
        xpad_ref[:, P0:P0 + HW] = y1                                     # pads stay zero
        y2 = conv3x3(w2_ref)
        # per-channel affine commutes with the spatial mean
        pooled = jnp.mean(y2, axis=-1, keepdims=True) * s2_ref[...] + sh2_ref[...]   # (C, 1)

        # ---- TransformerAttention on the pooled single-token sequence ---------
        # (kept in f32: a few hundred FLOPs; keeps the pooled path numerically tight)
        eye = (lax.broadcasted_iota(jnp.int32, (C, C), 0) ==
               lax.broadcasted_iota(jnp.int32, (C, C), 1))
        # column -> row via mask+reduce (avoids relying on tiny-shape transpose lowering)
        xa = jnp.sum(jnp.where(eye, pooled, 0.0), axis=0, keepdims=True)  # (1, C)

        def layer_norm(v, g, b):
            mu = jnp.mean(v, axis=-1, keepdims=True)
            var = jnp.mean((v - mu) ** 2, axis=-1, keepdims=True)
            return (v - mu) * lax.rsqrt(var + LN_EPS) * g + b

        xn = layer_norm(xa, g1_ref[...], b1_ref[...])
        # seq_len == 1  =>  softmax(q k^T) == 1  =>  attention output == v (q,k elided).
        v = jnp.dot(xn, wv_ref[...], preferred_element_type=jnp.float32) + bv_ref[...]
        on = layer_norm(v, g2_ref[...], b2_ref[...])
        h = jnp.dot(on, wf1_ref[...], preferred_element_type=jnp.float32) + bf1_ref[...]
        h = 0.5 * h * (1.0 + lax.erf(h * _INV_SQRT2))                    # exact GELU
        f = jnp.dot(h, wf2_ref[...], preferred_element_type=jnp.float32) + bf2_ref[...]
        att = f + xa                                                     # transformer residual

        # row -> column, then outer residual add + final ReLU (lane-dense store)
        att_col = jnp.sum(jnp.where(eye, att, 0.0), axis=1, keepdims=True)   # (C, 1)
        o_ref[0] = jnp.maximum(x + att_col, 0.0)

    return kernel


# ----------------------------------------------------------------------------
# One-time parameter preprocessing (hoisted out of the forward pass).
# ----------------------------------------------------------------------------
def preprocess_params(p, C):
    def fold_bn(g, b, mean, var):
        s = g / jnp.sqrt(var + BN_EPS)
        return s, b - mean * s

    s1, sh1 = fold_bn(p["bn1_g"], p["bn1_b"], p["bn1_mean"], p["bn1_var"])
    s2, sh2 = fold_bn(p["bn2_g"], p["bn2_b"], p["bn2_mean"], p["bn2_var"])
    # OIHW -> (O, 9*I) with row order matching the kernel's (dy, dx, ci) im2col layout.
    w1m = jnp.transpose(p["w1"], (0, 2, 3, 1)).reshape(C, 9 * C).astype(jnp.bfloat16)
    w2m = jnp.transpose(p["w2"], (0, 2, 3, 1)).reshape(C, 9 * C).astype(jnp.bfloat16)
    return {
        "w1m": w1m, "s1": s1.reshape(C, 1), "sh1": sh1.reshape(C, 1),
        "w2m": w2m, "s2": s2.reshape(C, 1), "sh2": sh2.reshape(C, 1),
        "ln1_g": p["ln1_g"].reshape(1, C), "ln1_b": p["ln1_b"].reshape(1, C),
        "wv": p["wqkv"][:, 2 * C:], "bv": p["bqkv"][2 * C:].reshape(1, C),
        "ln2_g": p["ln2_g"].reshape(1, C), "ln2_b": p["ln2_b"].reshape(1, C),
        "wf1": p["wf1"], "bf1": p["bf1"].reshape(1, 4 * C),
        "wf2": p["wf2"], "bf2": p["bf2"].reshape(1, C),
    }


# ----------------------------------------------------------------------------
# Fused forward wrapper.
# ----------------------------------------------------------------------------
def residual_attention_block(x_nchw, p):
    B, C, H, W = x_nchw.shape
    HW = H * W
    x_flat = x_nchw.reshape(B, C, HW)                  # lane-dense: last dim = H*W
    rep = lambda b: (0, 0)                             # grid-invariant operands

    out = pl.pallas_call(
        _make_fused_kernel(H, W),
        out_shape=jax.ShapeDtypeStruct((B, C, HW), jnp.float32),
        grid=(B,),
        in_specs=[
            pl.BlockSpec((1, C, HW), lambda b: (b, 0, 0)),              # x
            pl.BlockSpec((C, 9 * C), rep),                              # conv1 weight (bf16)
            pl.BlockSpec((C, 1), rep), pl.BlockSpec((C, 1), rep),       # bn1 scale/shift
            pl.BlockSpec((C, 9 * C), rep),                              # conv2 weight (bf16)
            pl.BlockSpec((C, 1), rep), pl.BlockSpec((C, 1), rep),       # bn2 scale/shift
            pl.BlockSpec((1, C), rep), pl.BlockSpec((1, C), rep),       # ln1 gamma/beta
            pl.BlockSpec((C, C), rep), pl.BlockSpec((1, C), rep),       # v-proj W / b
            pl.BlockSpec((1, C), rep), pl.BlockSpec((1, C), rep),       # ln2 gamma/beta
            pl.BlockSpec((C, 4 * C), rep), pl.BlockSpec((1, 4 * C), rep),   # ffn W1 / b1
            pl.BlockSpec((4 * C, C), rep), pl.BlockSpec((1, C), rep),       # ffn W2 / b2
        ],
        out_specs=pl.BlockSpec((1, C, HW), lambda b: (b, 0, 0)),
        scratch_shapes=[pltpu.VMEM((C, HW + 2 * (W + 1)), jnp.float32)],
        compiler_params=pltpu.CompilerParams(
            dimension_semantics=("parallel",)),        # batch steps independent (2 TCs on v7x)
    )(x_flat,
      p["w1m"], p["s1"], p["sh1"],
      p["w2m"], p["s2"], p["sh2"],
      p["ln1_g"], p["ln1_b"], p["wv"], p["bv"],
      p["ln2_g"], p["ln2_b"], p["wf1"], p["bf1"], p["wf2"], p["bf2"])
    return out.reshape(B, C, H, W)


# ----------------------------------------------------------------------------
# Pure-JAX reference (same semantics: bf16 conv operands, f32 accumulation).
# ----------------------------------------------------------------------------
def reference(x_nchw, p):
    dn = ("NCHW", "OIHW", "NCHW")

    def conv(inp, w):
        return lax.conv_general_dilated(
            inp.astype(jnp.bfloat16), w.astype(jnp.bfloat16), (1, 1), ((1, 1), (1, 1)),
            dimension_numbers=dn, preferred_element_type=jnp.float32)

    def bn(y, g, b, mean, var):
        s = g / jnp.sqrt(var + BN_EPS)
        sh = b - mean * s
        return y * s[None, :, None, None] + sh[None, :, None, None]

    y = conv(x_nchw, p["w1"])
    y = jnp.maximum(bn(y, p["bn1_g"], p["bn1_b"], p["bn1_mean"], p["bn1_var"]), 0.0)
    y = conv(y, p["w2"])
    y = bn(y, p["bn2_g"], p["bn2_b"], p["bn2_mean"], p["bn2_var"])
    pooled = jnp.mean(y, axis=(2, 3))                                    # (B, C)

    def ln(v, g, b):
        mu = v.mean(-1, keepdims=True)
        var = ((v - mu) ** 2).mean(-1, keepdims=True)
        return (v - mu) * lax.rsqrt(var + LN_EPS) * g + b

    C = pooled.shape[-1]
    xa = pooled
    xn = ln(xa, p["ln1_g"], p["ln1_b"])
    qkv = xn @ p["wqkv"] + p["bqkv"]
    q, k, v = qkv[:, :C], qkv[:, C:2 * C], qkv[:, 2 * C:]
    sim = jnp.sum(q * k, -1, keepdims=True)
    attn = jax.nn.softmax(sim, -1)                                       # == 1 (single key)
    out = attn * v
    on = ln(out, p["ln2_g"], p["ln2_b"])
    h = on @ p["wf1"] + p["bf1"]
    h = 0.5 * h * (1.0 + lax.erf(h * _INV_SQRT2))
    f = h @ p["wf2"] + p["bf2"]
    att = f + xa                                                         # (B, C)
    return jnp.maximum(x_nchw + att[:, :, None, None], 0.0)


def init_params(key, C):
    ks = jax.random.split(key, 14)
    n = lambda k, shape, s=0.1: s * jax.random.normal(k, shape, jnp.float32)
    return {
        "w1": n(ks[0], (C, C, 3, 3)),
        "w2": n(ks[1], (C, C, 3, 3)),
        "bn1_g": 1.0 + n(ks[2], (C,)), "bn1_b": n(ks[3], (C,)),
        "bn1_mean": jnp.zeros((C,), jnp.float32), "bn1_var": jnp.ones((C,), jnp.float32),
        "bn2_g": 1.0 + n(ks[4], (C,)), "bn2_b": n(ks[5], (C,)),
        "bn2_mean": jnp.zeros((C,), jnp.float32), "bn2_var": jnp.ones((C,), jnp.float32),
        "ln1_g": 1.0 + n(ks[6], (C,)), "ln1_b": n(ks[7], (C,)),
        "wqkv": n(ks[8], (C, 3 * C)), "bqkv": n(ks[9], (3 * C,)),
        "ln2_g": 1.0 + n(ks[10], (C,)), "ln2_b": n(ks[11], (C,)),
        "wf1": n(ks[12], (C, 4 * C)), "bf1": jnp.zeros((4 * C,), jnp.float32),
        "wf2": n(ks[13], (4 * C, C)), "bf2": jnp.zeros((C,), jnp.float32),
    }


if __name__ == "__main__":
    B, C, H, W = 2, 8, 16, 16      # in_channels == out_channels, stride=1, downsample=None
    key = jax.random.PRNGKey(0)
    kx, kp = jax.random.split(key)
    x = jax.random.normal(kx, (B, C, H, W), jnp.float32)
    raw_params = init_params(kp, C)
    params = preprocess_params(raw_params, C)          # one-time prep (hoisted out of fwd)

    fwd = jax.jit(residual_attention_block)
    out = jax.block_until_ready(fwd(x, params))

    ref = jax.block_until_ready(reference(x, raw_params))
    np.testing.assert_allclose(np.asarray(out), np.asarray(ref), rtol=1e-4, atol=1e-4)
    assert out.shape == (B, C, H, W)
    print("KERNEL_OK")
</pallas_src>

<mosaic_0001>
module attributes {stable_mosaic.version = 11 : i64} {
  func.func @kernel(%arg0: i32, %arg1: memref<1x8x256xf32, #tpu.memory_space<vmem>>, %arg2: memref<8x72xbf16, #tpu.memory_space<vmem>>, %arg3: memref<8x1xf32, #tpu.memory_space<vmem>>, %arg4: memref<8x1xf32, #tpu.memory_space<vmem>>, %arg5: memref<8x72xbf16, #tpu.memory_space<vmem>>, %arg6: memref<8x1xf32, #tpu.memory_space<vmem>>, %arg7: memref<8x1xf32, #tpu.memory_space<vmem>>, %arg8: memref<1x8xf32, #tpu.memory_space<vmem>>, %arg9: memref<1x8xf32, #tpu.memory_space<vmem>>, %arg10: memref<8x8xf32, #tpu.memory_space<vmem>>, %arg11: memref<1x8xf32, #tpu.memory_space<vmem>>, %arg12: memref<1x8xf32, #tpu.memory_space<vmem>>, %arg13: memref<1x8xf32, #tpu.memory_space<vmem>>, %arg14: memref<8x32xf32, #tpu.memory_space<vmem>>, %arg15: memref<1x32xf32, #tpu.memory_space<vmem>>, %arg16: memref<32x8xf32, #tpu.memory_space<vmem>>, %arg17: memref<1x8xf32, #tpu.memory_space<vmem>>, %arg18: memref<1x8x256xf32, #tpu.memory_space<vmem>>, %arg19: memref<8x290xf32, #tpu.memory_space<vmem>>) attributes {dimension_semantics = [#tpu.dimension_semantics<parallel>], iteration_bounds = array<i64: 2>, scalar_prefetch = 0 : i64, scratch_operands = 1 : i64, tpu.core_type = #tpu.core_type<tc>, window_params = [{transform_indices = @transform_0, window_bounds = array<i64: 1, 8, 256>}, {pipeline_mode = #tpu.pipeline_mode<synchronous>, transform_indices = @transform_1, window_bounds = array<i64: 8, 72>}, {pipeline_mode = #tpu.pipeline_mode<synchronous>, transform_indices = @transform_2, window_bounds = array<i64: 8, 1>}, {pipeline_mode = #tpu.pipeline_mode<synchronous>, transform_indices = @transform_3, window_bounds = array<i64: 8, 1>}, {pipeline_mode = #tpu.pipeline_mode<synchronous>, transform_indices = @transform_4, window_bounds = array<i64: 8, 72>}, {pipeline_mode = #tpu.pipeline_mode<synchronous>, transform_indices = @transform_5, window_bounds = array<i64: 8, 1>}, {pipeline_mode = #tpu.pipeline_mode<synchronous>, transform_indices = @transform_6, window_bounds = array<i64: 8, 1>}, {pipeline_mode = #tpu.pipeline_mode<synchronous>, transform_indices = @transform_7, window_bounds = array<i64: 1, 8>}, {pipeline_mode = #tpu.pipeline_mode<synchronous>, transform_indices = @transform_8, window_bounds = array<i64: 1, 8>}, {pipeline_mode = #tpu.pipeline_mode<synchronous>, transform_indices = @transform_9, window_bounds = array<i64: 8, 8>}, {pipeline_mode = #tpu.pipeline_mode<synchronous>, transform_indices = @transform_10, window_bounds = array<i64: 1, 8>}, {pipeline_mode = #tpu.pipeline_mode<synchronous>, transform_indices = @transform_11, window_bounds = array<i64: 1, 8>}, {pipeline_mode = #tpu.pipeline_mode<synchronous>, transform_indices = @transform_12, window_bounds = array<i64: 1, 8>}, {pipeline_mode = #tpu.pipeline_mode<synchronous>, transform_indices = @transform_13, window_bounds = array<i64: 8, 32>}, {pipeline_mode = #tpu.pipeline_mode<synchronous>, transform_indices = @transform_14, window_bounds = array<i64: 1, 32>}, {pipeline_mode = #tpu.pipeline_mode<synchronous>, transform_indices = @transform_15, window_bounds = array<i64: 32, 8>}, {pipeline_mode = #tpu.pipeline_mode<synchronous>, transform_indices = @transform_16, window_bounds = array<i64: 1, 8>}, {transform_indices = @transform_17, window_bounds = array<i64: 1, 8, 256>}]} {
    %c0 = arith.constant 0 : index
    %c0_0 = arith.constant 0 : index
    %c0_1 = arith.constant 0 : index
    %0 = vector.load %arg1[%c0, %c0_0, %c0_1] : memref<1x8x256xf32, #tpu.memory_space<vmem>>, vector<1x8x256xf32>
    %1 = vector.shape_cast %0 : vector<1x8x256xf32> to vector<8x256xf32>
    %2 = tpu.iota {dimensions = array<i32: 1>} : vector<1x256xi32>
    %c16_i32 = arith.constant 16 : i32
    %c0_i32 = arith.constant 0 : i32
    %3 = arith.cmpi eq, %c16_i32, %c0_i32 : i32
    %c1_i32 = arith.constant 1 : i32
    %4 = arith.select %3, %c1_i32, %c16_i32 : i32
    %5 = vector.broadcast %4 : i32 to vector<1x256xi32>
    %6 = arith.remsi %2, %5 : vector<1x256xi32>
    %c0_i32_2 = arith.constant 0 : i32
    %7 = vector.broadcast %c0_i32_2 : i32 to vector<1x256xi32>
    %8 = arith.cmpi ne, %6, %7 : vector<1x256xi32>
    %c0_i32_3 = arith.constant 0 : i32
    %9 = vector.broadcast %c0_i32_3 : i32 to vector<1x256xi32>
    %10 = arith.cmpi slt, %6, %9 : vector<1x256xi32>
    %c0_i32_4 = arith.constant 0 : i32
    %11 = arith.cmpi slt, %4, %c0_i32_4 : i32
    %12 = vector.broadcast %11 : i1 to vector<1x256xi1>
    %13 = vector.broadcast %12 : vector<1x256xi1> to vector<1x256xi1>
    %14 = arith.xori %10, %13 : vector<1x256xi1>
    %15 = arith.andi %14, %8 : vector<1x256xi1>
    %16 = vector.broadcast %4 : i32 to vector<1x256xi32>
    %17 = arith.addi %6, %16 : vector<1x256xi32>
    %18 = arith.select %15, %17, %6 : vector<1x256xi1>, vector<1x256xi32>
    %c1_i32_5 = arith.constant 1 : i32
    %19 = vector.broadcast %c1_i32_5 : i32 to vector<1x256xi32>
    %20 = arith.cmpi sge, %18, %19 : vector<1x256xi32>
    %c14_i32 = arith.constant 14 : i32
    %21 = vector.broadcast %c14_i32 : i32 to vector<1x256xi32>
    %22 = arith.cmpi sle, %18, %21 : vector<1x256xi32>
    %cst = arith.constant 0.000000e+00 : f32
    %23 = vector.broadcast %cst : f32 to vector<8x290xf32>
    %c0_6 = arith.constant 0 : index
    %c0_7 = arith.constant 0 : index
    %24 = vector.load %arg19[%c0_6, %c0_7] : memref<8x290xf32, #tpu.memory_space<vmem>>, vector<8x290xf32>
    tpu.vector_store %arg19[%c0_6, %c0_7], %23 {strides = array<i32>} : memref<8x290xf32, #tpu.memory_space<vmem>>, vector<8x290xf32>,
    %c0_8 = arith.constant 0 : index
    %c17 = arith.constant 17 : index
    %25 = vector.load %arg19[%c0_8, %c17] : memref<8x290xf32, #tpu.memory_space<vmem>>, vector<8x256xf32>
    tpu.vector_store %arg19[%c0_8, %c17], %1 {strides = array<i32>} : memref<8x290xf32, #tpu.memory_space<vmem>>, vector<8x256xf32>,
    %c0_9 = arith.constant 0 : index
    %c0_10 = arith.constant 0 : index
    %26 = vector.load %arg19[%c0_9, %c0_10] : memref<8x290xf32, #tpu.memory_space<vmem>>, vector<8x256xf32>
    %cst_11 = arith.constant 0.000000e+00 : f32
    %27 = vector.shape_cast %20 : vector<1x256xi1> to vector<1x256xi1>
    %28 = vector.broadcast %27 : vector<1x256xi1> to vector<8x256xi1>
    %29 = vector.broadcast %cst_11 : f32 to vector<8x256xf32>
    %30 = arith.select %28, %26, %29 : vector<8x256xi1>, vector<8x256xf32>
    %c0_12 = arith.constant 0 : index
    %c1 = arith.constant 1 : index
    %31 = vector.load %arg19[%c0_12, %c1] : memref<8x290xf32, #tpu.memory_space<vmem>>, vector<8x256xf32>
    %c0_13 = arith.constant 0 : index
    %c2 = arith.constant 2 : index
    %32 = vector.load %arg19[%c0_13, %c2] : memref<8x290xf32, #tpu.memory_space<vmem>>, vector<8x256xf32>
    %cst_14 = arith.constant 0.000000e+00 : f32
    %33 = vector.shape_cast %22 : vector<1x256xi1> to vector<1x256xi1>
    %34 = vector.broadcast %33 : vector<1x256xi1> to vector<8x256xi1>
    %35 = vector.broadcast %cst_14 : f32 to vector<8x256xf32>
    %36 = arith.select %34, %32, %35 : vector<8x256xi1>, vector<8x256xf32>
    %c0_15 = arith.constant 0 : index
    %c16 = arith.constant 16 : index
    %37 = vector.load %arg19[%c0_15, %c16] : memref<8x290xf32, #tpu.memory_space<vmem>>, vector<8x256xf32>
    %cst_16 = arith.constant 0.000000e+00 : f32
    %38 = vector.shape_cast %20 : vector<1x256xi1> to vector<1x256xi1>
    %39 = vector.broadcast %38 : vector<1x256xi1> to vector<8x256xi1>
    %40 = vector.broadcast %cst_16 : f32 to vector<8x256xf32>
    %41 = arith.select %39, %37, %40 : vector<8x256xi1>, vector<8x256xf32>
    %c0_17 = arith.constant 0 : index
    %c17_18 = arith.constant 17 : index
    %42 = vector.load %arg19[%c0_17, %c17_18] : memref<8x290xf32, #tpu.memory_space<vmem>>, vector<8x256xf32>
    %c0_19 = arith.constant 0 : index
    %c18 = arith.constant 18 : index
    %43 = vector.load %arg19[%c0_19, %c18] : memref<8x290xf32, #tpu.memory_space<vmem>>, vector<8x256xf32>
    %cst_20 = arith.constant 0.000000e+00 : f32
    %44 = vector.shape_cast %22 : vector<1x256xi1> to vector<1x256xi1>
    %45 = vector.broadcast %44 : vector<1x256xi1> to vector<8x256xi1>
    %46 = vector.broadcast %cst_20 : f32 to vector<8x256xf32>
    %47 = arith.select %45, %43, %46 : vector<8x256xi1>, vector<8x256xf32>
    %c0_21 = arith.constant 0 : index
    %c32 = arith.constant 32 : index
    %48 = vector.load %arg19[%c0_21, %c32] : memref<8x290xf32, #tpu.memory_space<vmem>>, vector<8x256xf32>
    %cst_22 = arith.constant 0.000000e+00 : f32
    %49 = vector.shape_cast %20 : vector<1x256xi1> to vector<1x256xi1>
    %50 = vector.broadcast %49 : vector<1x256xi1> to vector<8x256xi1>
    %51 = vector.broadcast %cst_22 : f32 to vector<8x256xf32>
    %52 = arith.select %50, %48, %51 : vector<8x256xi1>, vector<8x256xf32>
    %c0_23 = arith.constant 0 : index
    %c33 = arith.constant 33 : index
    %53 = vector.load %arg19[%c0_23, %c33] : memref<8x290xf32, #tpu.memory_space<vmem>>, vector<8x256xf32>
    %c0_24 = arith.constant 0 : index
    %c34 = arith.constant 34 : index
    %54 = vector.load %arg19[%c0_24, %c34] : memref<8x290xf32, #tpu.memory_space<vmem>>, vector<8x256xf32>
    %cst_25 = arith.constant 0.000000e+00 : f32
    %55 = vector.shape_cast %22 : vector<1x256xi1> to vector<1x256xi1>
    %56 = vector.broadcast %55 : vector<1x256xi1> to vector<8x256xi1>
    %57 = vector.broadcast %cst_25 : f32 to vector<8x256xf32>
    %58 = arith.select %56, %54, %57 : vector<8x256xi1>, vector<8x256xf32>
    %59 = tpu.concatenate %30, %31, %36, %41, %42, %47, %52, %53, %58 in 0 : vector<8x256xf32>, vector<8x256xf32>, vector<8x256xf32>, vector<8x256xf32>, vector<8x256xf32>, vector<8x256xf32>, vector<8x256xf32>, vector<8x256xf32>, vector<8x256xf32> -> vector<72x256xf32>
    %60 = arith.truncf %59 : vector<72x256xf32> to vector<72x256xbf16>
    %c0_26 = arith.constant 0 : index
    %c0_27 = arith.constant 0 : index
    %61 = vector.load %arg2[%c0_26, %c0_27] : memref<8x72xbf16, #tpu.memory_space<vmem>>, vector<8x72xbf16>
    %cst_28 = arith.constant dense<0.000000e+00> : vector<8x256xf32>
    %62 = tpu.matmul %61, %60, %cst_28 {dimension_numbers = #tpu.dot_dimension_numbers<[1], [0], [0], [1], [0, 0, 1, 1], [], []>} : vector<8x72xbf16>, vector<72x256xbf16>, vector<8x256xf32> -> vector<8x256xf32>
    %c0_29 = arith.constant 0 : index
    %c0_30 = arith.constant 0 : index
    %63 = vector.load %arg3[%c0_29, %c0_30] : memref<8x1xf32, #tpu.memory_space<vmem>>, vector<8x1xf32>
    %64 = vector.broadcast %63 : vector<8x1xf32> to vector<8x256xf32>
    %65 = arith.mulf %62, %64 : vector<8x256xf32>
    %c0_31 = arith.constant 0 : index
    %c0_32 = arith.constant 0 : index
    %66 = vector.load %arg4[%c0_31, %c0_32] : memref<8x1xf32, #tpu.memory_space<vmem>>, vector<8x1xf32>
    %67 = vector.broadcast %66 : vector<8x1xf32> to vector<8x256xf32>
    %68 = arith.addf %65, %67 : vector<8x256xf32>
    %cst_33 = arith.constant 0.000000e+00 : f32
    %69 = vector.broadcast %cst_33 : f32 to vector<8x256xf32>
    %70 = arith.maximumf %68, %69 : vector<8x256xf32>
    %c0_34 = arith.constant 0 : index
    %c17_35 = arith.constant 17 : index
    %71 = vector.load %arg19[%c0_34, %c17_35] : memref<8x290xf32, #tpu.memory_space<vmem>>, vector<8x256xf32>
    tpu.vector_store %arg19[%c0_34, %c17_35], %70 {strides = array<i32>} : memref<8x290xf32, #tpu.memory_space<vmem>>, vector<8x256xf32>,
    %c0_36 = arith.constant 0 : index
    %c0_37 = arith.constant 0 : index
    %72 = vector.load %arg19[%c0_36, %c0_37] : memref<8x290xf32, #tpu.memory_space<vmem>>, vector<8x256xf32>
    %cst_38 = arith.constant 0.000000e+00 : f32
    %73 = vector.shape_cast %20 : vector<1x256xi1> to vector<1x256xi1>
    %74 = vector.broadcast %73 : vector<1x256xi1> to vector<8x256xi1>
    %75 = vector.broadcast %cst_38 : f32 to vector<8x256xf32>
    %76 = arith.select %74, %72, %75 : vector<8x256xi1>, vector<8x256xf32>
    %c0_39 = arith.constant 0 : index
    %c1_40 = arith.constant 1 : index
    %77 = vector.load %arg19[%c0_39, %c1_40] : memref<8x290xf32, #tpu.memory_space<vmem>>, vector<8x256xf32>
    %c0_41 = arith.constant 0 : index
    %c2_42 = arith.constant 2 : index
    %78 = vector.load %arg19[%c0_41, %c2_42] : memref<8x290xf32, #tpu.memory_space<vmem>>, vector<8x256xf32>
    %cst_43 = arith.constant 0.000000e+00 : f32
    %79 = vector.shape_cast %22 : vector<1x256xi1> to vector<1x256xi1>
    %80 = vector.broadcast %79 : vector<1x256xi1> to vector<8x256xi1>
    %81 = vector.broadcast %cst_43 : f32 to vector<8x256xf32>
    %82 = arith.select %80, %78, %81 : vector<8x256xi1>, vector<8x256xf32>
    %c0_44 = arith.constant 0 : index
    %c16_45 = arith.constant 16 : index
    %83 = vector.load %arg19[%c0_44, %c16_45] : memref<8x290xf32, #tpu.memory_space<vmem>>, vector<8x256xf32>
    %cst_46 = arith.constant 0.000000e+00 : f32
    %84 = vector.shape_cast %20 : vector<1x256xi1> to vector<1x256xi1>
    %85 = vector.broadcast %84 : vector<1x256xi1> to vector<8x256xi1>
    %86 = vector.broadcast %cst_46 : f32 to vector<8x256xf32>
    %87 = arith.select %85, %83, %86 : vector<8x256xi1>, vector<8x256xf32>
    %c0_47 = arith.constant 0 : index
    %c17_48 = arith.constant 17 : index
    %88 = vector.load %arg19[%c0_47, %c17_48] : memref<8x290xf32, #tpu.memory_space<vmem>>, vector<8x256xf32>
    %c0_49 = arith.constant 0 : index
    %c18_50 = arith.constant 18 : index
    %89 = vector.load %arg19[%c0_49, %c18_50] : memref<8x290xf32, #tpu.memory_space<vmem>>, vector<8x256xf32>
    %cst_51 = arith.constant 0.000000e+00 : f32
    %90 = vector.shape_cast %22 : vector<1x256xi1> to vector<1x256xi1>
    %91 = vector.broadcast %90 : vector<1x256xi1> to vector<8x256xi1>
    %92 = vector.broadcast %cst_51 : f32 to vector<8x256xf32>
    %93 = arith.select %91, %89, %92 : vector<8x256xi1>, vector<8x256xf32>
    %c0_52 = arith.constant 0 : index
    %c32_53 = arith.constant 32 : index
    %94 = vector.load %arg19[%c0_52, %c32_53] : memref<8x290xf32, #tpu.memory_space<vmem>>, vector<8x256xf32>
    %cst_54 = arith.constant 0.000000e+00 : f32
    %95 = vector.shape_cast %20 : vector<1x256xi1> to vector<1x256xi1>
    %96 = vector.broadcast %95 : vector<1x256xi1> to vector<8x256xi1>
    %97 = vector.broadcast %cst_54 : f32 to vector<8x256xf32>
    %98 = arith.select %96, %94, %97 : vector<8x256xi1>, vector<8x256xf32>
    %c0_55 = arith.constant 0 : index
    %c33_56 = arith.constant 33 : index
    %99 = vector.load %arg19[%c0_55, %c33_56] : memref<8x290xf32, #tpu.memory_space<vmem>>, vector<8x256xf32>
    %c0_57 = arith.constant 0 : index
    %c34_58 = arith.constant 34 : index
    %100 = vector.load %arg19[%c0_57, %c34_58] : memref<8x290xf32, #tpu.memory_space<vmem>>, vector<8x256xf32>
    %cst_59 = arith.constant 0.000000e+00 : f32
    %101 = vector.shape_cast %22 : vector<1x256xi1> to vector<1x256xi1>
    %102 = vector.broadcast %101 : vector<1x256xi1> to vector<8x256xi1>
    %103 = vector.broadcast %cst_59 : f32 to vector<8x256xf32>
    %104 = arith.select %102, %100, %103 : vector<8x256xi1>, vector<8x256xf32>
    %105 = tpu.concatenate %76, %77, %82, %87, %88, %93, %98, %99, %104 in 0 : vector<8x256xf32>, vector<8x256xf32>, vector<8x256xf32>, vector<8x256xf32>, vector<8x256xf32>, vector<8x256xf32>, vector<8x256xf32>, vector<8x256xf32>, vector<8x256xf32> -> vector<72x256xf32>
    %106 = arith.truncf %105 : vector<72x256xf32> to vector<72x256xbf16>
    %c0_60 = arith.constant 0 : index
    %c0_61 = arith.constant 0 : index
    %107 = vector.load %arg5[%c0_60, %c0_61] : memref<8x72xbf16, #tpu.memory_space<vmem>>, vector<8x72xbf16>
    %cst_62 = arith.constant dense<0.000000e+00> : vector<8x256xf32>
    %108 = tpu.matmul %107, %106, %cst_62 {dimension_numbers = #tpu.dot_dimension_numbers<[1], [0], [0], [1], [0, 0, 1, 1], [], []>} : vector<8x72xbf16>, vector<72x256xbf16>, vector<8x256xf32> -> vector<8x256xf32>
    %cst_63 = arith.constant dense<0.000000e+00> : vector<8xf32>
    %109 = vector.multi_reduction <add>, %108, %cst_63 [1] : vector<8x256xf32> to vector<8xf32>
    %110 = vector.shape_cast %109 : vector<8xf32> to vector<8x1xf32>
    %cst_64 = arith.constant 2.560000e+02 : f32
    %111 = vector.broadcast %cst_64 : f32 to vector<8x1xf32>
    %112 = arith.divf %110, %111 : vector<8x1xf32>
    %c0_65 = arith.constant 0 : index
    %c0_66 = arith.constant 0 : index
    %113 = vector.load %arg6[%c0_65, %c0_66] : memref<8x1xf32, #tpu.memory_space<vmem>>, vector<8x1xf32>
    %114 = arith.mulf %112, %113 : vector<8x1xf32>
    %c0_67 = arith.constant 0 : index
    %c0_68 = arith.constant 0 : index
    %115 = vector.load %arg7[%c0_67, %c0_68] : memref<8x1xf32, #tpu.memory_space<vmem>>, vector<8x1xf32>
    %116 = arith.addf %114, %115 : vector<8x1xf32>
    %117 = tpu.iota {dimensions = array<i32: 0>} : vector<8x8xi32>
    %118 = tpu.iota {dimensions = array<i32: 1>} : vector<8x8xi32>
    %119 = arith.cmpi eq, %117, %118 : vector<8x8xi32>
    %cst_69 = arith.constant 0.000000e+00 : f32
    %120 = vector.shape_cast %116 : vector<8x1xf32> to vector<8x1xf32>
    %121 = vector.broadcast %120 : vector<8x1xf32> to vector<8x8xf32>
    %122 = vector.broadcast %cst_69 : f32 to vector<8x8xf32>
    %123 = arith.select %119, %121, %122 : vector<8x8xi1>, vector<8x8xf32>
    %cst_70 = arith.constant dense<0.000000e+00> : vector<8xf32>
    %124 = vector.multi_reduction <add>, %123, %cst_70 [0] : vector<8x8xf32> to vector<8xf32>
    %125 = vector.shape_cast %124 : vector<8xf32> to vector<1x8xf32>
    %c0_71 = arith.constant 0 : index
    %c0_72 = arith.constant 0 : index
    %126 = vector.load %arg8[%c0_71, %c0_72] : memref<1x8xf32, #tpu.memory_space<vmem>>, vector<1x8xf32>
    %c0_73 = arith.constant 0 : index
    %c0_74 = arith.constant 0 : index
    %127 = vector.load %arg9[%c0_73, %c0_74] : memref<1x8xf32, #tpu.memory_space<vmem>>, vector<1x8xf32>
    %cst_75 = arith.constant dense<0.000000e+00> : vector<1xf32>
    %128 = vector.multi_reduction <add>, %125, %cst_75 [1] : vector<1x8xf32> to vector<1xf32>
    %129 = vector.shape_cast %128 : vector<1xf32> to vector<1x1xf32>
    %cst_76 = arith.constant 8.000000e+00 : f32
    %130 = vector.broadcast %cst_76 : f32 to vector<1x1xf32>
    %131 = arith.divf %129, %130 : vector<1x1xf32>
    %132 = vector.broadcast %131 : vector<1x1xf32> to vector<1x8xf32>
    %133 = arith.subf %125, %132 : vector<1x8xf32>
    %134 = arith.mulf %133, %133 : vector<1x8xf32>
    %cst_77 = arith.constant dense<0.000000e+00> : vector<1xf32>
    %135 = vector.multi_reduction <add>, %134, %cst_77 [1] : vector<1x8xf32> to vector<1xf32>
    %136 = vector.shape_cast %135 : vector<1xf32> to vector<1x1xf32>
    %cst_78 = arith.constant 8.000000e+00 : f32
    %137 = vector.broadcast %cst_78 : f32 to vector<1x1xf32>
    %138 = arith.divf %136, %137 : vector<1x1xf32>
    %139 = vector.broadcast %131 : vector<1x1xf32> to vector<1x8xf32>
    %140 = arith.subf %125, %139 : vector<1x8xf32>
    %cst_79 = arith.constant 9.99999974E-6 : f32
    %141 = vector.broadcast %cst_79 : f32 to vector<1x1xf32>
    %142 = arith.addf %138, %141 : vector<1x1xf32>
    %143 = math.rsqrt %142 : vector<1x1xf32>
    %144 = vector.broadcast %143 : vector<1x1xf32> to vector<1x8xf32>
    %145 = arith.mulf %140, %144 : vector<1x8xf32>
    %146 = arith.mulf %145, %126 : vector<1x8xf32>
    %147 = arith.addf %146, %127 : vector<1x8xf32>
    %c0_80 = arith.constant 0 : index
    %c0_81 = arith.constant 0 : index
    %148 = vector.load %arg10[%c0_80, %c0_81] : memref<8x8xf32, #tpu.memory_space<vmem>>, vector<8x8xf32>
    %cst_82 = arith.constant dense<0.000000e+00> : vector<1x8xf32>
    %149 = tpu.matmul %147, %148, %cst_82 {dimension_numbers = #tpu.dot_dimension_numbers<[1], [0], [0], [1], [0, 0, 1, 1], [], []>} : vector<1x8xf32>, vector<8x8xf32>, vector<1x8xf32> -> vector<1x8xf32>
    %c0_83 = arith.constant 0 : index
    %c0_84 = arith.constant 0 : index
    %150 = vector.load %arg11[%c0_83, %c0_84] : memref<1x8xf32, #tpu.memory_space<vmem>>, vector<1x8xf32>
    %151 = arith.addf %149, %150 : vector<1x8xf32>
    %c0_85 = arith.constant 0 : index
    %c0_86 = arith.constant 0 : index
    %152 = vector.load %arg12[%c0_85, %c0_86] : memref<1x8xf32, #tpu.memory_space<vmem>>, vector<1x8xf32>
    %c0_87 = arith.constant 0 : index
    %c0_88 = arith.constant 0 : index
    %153 = vector.load %arg13[%c0_87, %c0_88] : memref<1x8xf32, #tpu.memory_space<vmem>>, vector<1x8xf32>
    %cst_89 = arith.constant dense<0.000000e+00> : vector<1xf32>
    %154 = vector.multi_reduction <add>, %151, %cst_89 [1] : vector<1x8xf32> to vector<1xf32>
    %155 = vector.shape_cast %154 : vector<1xf32> to vector<1x1xf32>
    %cst_90 = arith.constant 8.000000e+00 : f32
    %156 = vector.broadcast %cst_90 : f32 to vector<1x1xf32>
    %157 = arith.divf %155, %156 : vector<1x1xf32>
    %158 = vector.broadcast %157 : vector<1x1xf32> to vector<1x8xf32>
    %159 = arith.subf %151, %158 : vector<1x8xf32>
    %160 = arith.mulf %159, %159 : vector<1x8xf32>
    %cst_91 = arith.constant dense<0.000000e+00> : vector<1xf32>
    %161 = vector.multi_reduction <add>, %160, %cst_91 [1] : vector<1x8xf32> to vector<1xf32>
    %162 = vector.shape_cast %161 : vector<1xf32> to vector<1x1xf32>
    %cst_92 = arith.constant 8.000000e+00 : f32
    %163 = vector.broadcast %cst_92 : f32 to vector<1x1xf32>
    %164 = arith.divf %162, %163 : vector<1x1xf32>
    %165 = vector.broadcast %157 : vector<1x1xf32> to vector<1x8xf32>
    %166 = arith.subf %151, %165 : vector<1x8xf32>
    %cst_93 = arith.constant 9.99999974E-6 : f32
    %167 = vector.broadcast %cst_93 : f32 to vector<1x1xf32>
    %168 = arith.addf %164, %167 : vector<1x1xf32>
    %169 = math.rsqrt %168 : vector<1x1xf32>
    %170 = vector.broadcast %169 : vector<1x1xf32> to vector<1x8xf32>
    %171 = arith.mulf %166, %170 : vector<1x8xf32>
    %172 = arith.mulf %171, %152 : vector<1x8xf32>
    %173 = arith.addf %172, %153 : vector<1x8xf32>
    %c0_94 = arith.constant 0 : index
    %c0_95 = arith.constant 0 : index
    %174 = vector.load %arg14[%c0_94, %c0_95] : memref<8x32xf32, #tpu.memory_space<vmem>>, vector<8x32xf32>
    %cst_96 = arith.constant dense<0.000000e+00> : vector<1x32xf32>
    %175 = tpu.matmul %173, %174, %cst_96 {dimension_numbers = #tpu.dot_dimension_numbers<[1], [0], [0], [1], [0, 0, 1, 1], [], []>} : vector<1x8xf32>, vector<8x32xf32>, vector<1x32xf32> -> vector<1x32xf32>
    %c0_97 = arith.constant 0 : index
    %c0_98 = arith.constant 0 : index
    %176 = vector.load %arg15[%c0_97, %c0_98] : memref<1x32xf32, #tpu.memory_space<vmem>>, vector<1x32xf32>
    %177 = arith.addf %175, %176 : vector<1x32xf32>
    %cst_99 = arith.constant 5.000000e-01 : f32
    %178 = vector.broadcast %cst_99 : f32 to vector<1x32xf32>
    %179 = arith.mulf %178, %177 : vector<1x32xf32>
    %cst_100 = arith.constant 0.707106769 : f32
    %180 = vector.broadcast %cst_100 : f32 to vector<1x32xf32>
    %181 = arith.mulf %177, %180 : vector<1x32xf32>
    %182 = math.erf %181 : vector<1x32xf32>
    %cst_101 = arith.constant 1.000000e+00 : f32
    %183 = vector.broadcast %cst_101 : f32 to vector<1x32xf32>
    %184 = arith.addf %183, %182 : vector<1x32xf32>
    %185 = arith.mulf %179, %184 : vector<1x32xf32>
    %c0_102 = arith.constant 0 : index
    %c0_103 = arith.constant 0 : index
    %186 = vector.load %arg16[%c0_102, %c0_103] : memref<32x8xf32, #tpu.memory_space<vmem>>, vector<32x8xf32>
    %cst_104 = arith.constant dense<0.000000e+00> : vector<1x8xf32>
    %187 = tpu.matmul %185, %186, %cst_104 {dimension_numbers = #tpu.dot_dimension_numbers<[1], [0], [0], [1], [0, 0, 1, 1], [], []>} : vector<1x32xf32>, vector<32x8xf32>, vector<1x8xf32> -> vector<1x8xf32>
    %c0_105 = arith.constant 0 : index
    %c0_106 = arith.constant 0 : index
    %188 = vector.load %arg17[%c0_105, %c0_106] : memref<1x8xf32, #tpu.memory_space<vmem>>, vector<1x8xf32>
    %189 = arith.addf %187, %188 : vector<1x8xf32>
    %190 = arith.addf %189, %125 : vector<1x8xf32>
    %cst_107 = arith.constant 0.000000e+00 : f32
    %191 = vector.shape_cast %190 : vector<1x8xf32> to vector<1x8xf32>
    %192 = vector.broadcast %191 : vector<1x8xf32> to vector<8x8xf32>
    %193 = vector.broadcast %cst_107 : f32 to vector<8x8xf32>
    %194 = arith.select %119, %192, %193 : vector<8x8xi1>, vector<8x8xf32>
    %cst_108 = arith.constant dense<0.000000e+00> : vector<8xf32>
    %195 = vector.multi_reduction <add>, %194, %cst_108 [1] : vector<8x8xf32> to vector<8xf32>
    %196 = vector.shape_cast %195 : vector<8xf32> to vector<8x1xf32>
    %197 = vector.broadcast %196 : vector<8x1xf32> to vector<8x256xf32>
    %198 = arith.addf %1, %197 : vector<8x256xf32>
    %cst_109 = arith.constant 0.000000e+00 : f32
    %199 = vector.broadcast %cst_109 : f32 to vector<8x256xf32>
    %200 = arith.maximumf %198, %199 : vector<8x256xf32>
    %c0_110 = arith.constant 0 : index
    %c0_111 = arith.constant 0 : index
    %c0_112 = arith.constant 0 : index
    %201 = vector.load %arg18[%c0_110, %c0_111, %c0_112] : memref<1x8x256xf32, #tpu.memory_space<vmem>>, vector<1x8x256xf32>
    %202 = vector.shape_cast %201 : vector<1x8x256xf32> to vector<8x256xf32>
    %203 = vector.shape_cast %200 : vector<8x256xf32> to vector<1x8x256xf32>
    tpu.vector_store %arg18[%c0_110, %c0_111, %c0_112], %203 {strides = array<i32>} : memref<1x8x256xf32, #tpu.memory_space<vmem>>, vector<1x8x256xf32>,
    return
  }
  func.func @transform_0(%arg0: i32) -> (i32, i32, i32) {
    %c0_i32 = arith.constant 0 : i32
    %c0_i32_0 = arith.constant 0 : i32
    %c0_i32_1 = arith.constant 0 : i32
    return %arg0, %c0_i32, %c0_i32_0 : i32, i32, i32
  }
  func.func @transform_1(%arg0: i32) -> (i32, i32) {
    %c0_i32 = arith.constant 0 : i32
    %c0_i32_0 = arith.constant 0 : i32
    %c0_i32_1 = arith.constant 0 : i32
    return %c0_i32, %c0_i32_0 : i32, i32
  }
  func.func @transform_2(%arg0: i32) -> (i32, i32) {
    %c0_i32 = arith.constant 0 : i32
    %c0_i32_0 = arith.constant 0 : i32
    %c0_i32_1 = arith.constant 0 : i32
    return %c0_i32, %c0_i32_0 : i32, i32
  }
  func.func @transform_3(%arg0: i32) -> (i32, i32) {
    %c0_i32 = arith.constant 0 : i32
    %c0_i32_0 = arith.constant 0 : i32
    %c0_i32_1 = arith.constant 0 : i32
    return %c0_i32, %c0_i32_0 : i32, i32
  }
  func.func @transform_4(%arg0: i32) -> (i32, i32) {
    %c0_i32 = arith.constant 0 : i32
    %c0_i32_0 = arith.constant 0 : i32
    %c0_i32_1 = arith.constant 0 : i32
    return %c0_i32, %c0_i32_0 : i32, i32
  }
  func.func @transform_5(%arg0: i32) -> (i32, i32) {
    %c0_i32 = arith.constant 0 : i32
    %c0_i32_0 = arith.constant 0 : i32
    %c0_i32_1 = arith.constant 0 : i32
    return %c0_i32, %c0_i32_0 : i32, i32
  }
  func.func @transform_6(%arg0: i32) -> (i32, i32) {
    %c0_i32 = arith.constant 0 : i32
    %c0_i32_0 = arith.constant 0 : i32
    %c0_i32_1 = arith.constant 0 : i32
    return %c0_i32, %c0_i32_0 : i32, i32
  }
  func.func @transform_7(%arg0: i32) -> (i32, i32) {
    %c0_i32 = arith.constant 0 : i32
    %c0_i32_0 = arith.constant 0 : i32
    %c0_i32_1 = arith.constant 0 : i32
    return %c0_i32, %c0_i32_0 : i32, i32
  }
  func.func @transform_8(%arg0: i32) -> (i32, i32) {
    %c0_i32 = arith.constant 0 : i32
    %c0_i32_0 = arith.constant 0 : i32
    %c0_i32_1 = arith.constant 0 : i32
    return %c0_i32, %c0_i32_0 : i32, i32
  }
  func.func @transform_9(%arg0: i32) -> (i32, i32) {
    %c0_i32 = arith.constant 0 : i32
    %c0_i32_0 = arith.constant 0 : i32
    %c0_i32_1 = arith.constant 0 : i32
    return %c0_i32, %c0_i32_0 : i32, i32
  }
  func.func @transform_10(%arg0: i32) -> (i32, i32) {
    %c0_i32 = arith.constant 0 : i32
    %c0_i32_0 = arith.constant 0 : i32
    %c0_i32_1 = arith.constant 0 : i32
    return %c0_i32, %c0_i32_0 : i32, i32
  }
  func.func @transform_11(%arg0: i32) -> (i32, i32) {
    %c0_i32 = arith.constant 0 : i32
    %c0_i32_0 = arith.constant 0 : i32
    %c0_i32_1 = arith.constant 0 : i32
    return %c0_i32, %c0_i32_0 : i32, i32
  }
  func.func @transform_12(%arg0: i32) -> (i32, i32) {
    %c0_i32 = arith.constant 0 : i32
    %c0_i32_0 = arith.constant 0 : i32
    %c0_i32_1 = arith.constant 0 : i32
    return %c0_i32, %c0_i32_0 : i32, i32
  }
  func.func @transform_13(%arg0: i32) -> (i32, i32) {
    %c0_i32 = arith.constant 0 : i32
    %c0_i32_0 = arith.constant 0 : i32
    %c0_i32_1 = arith.constant 0 : i32
    return %c0_i32, %c0_i32_0 : i32, i32
  }
  func.func @transform_14(%arg0: i32) -> (i32, i32) {
    %c0_i32 = arith.constant 0 : i32
    %c0_i32_0 = arith.constant 0 : i32
    %c0_i32_1 = arith.constant 0 : i32
    return %c0_i32, %c0_i32_0 : i32, i32
  }
  func.func @transform_15(%arg0: i32) -> (i32, i32) {
    %c0_i32 = arith.constant 0 : i32
    %c0_i32_0 = arith.constant 0 : i32
    %c0_i32_1 = arith.constant 0 : i32
    return %c0_i32, %c0_i32_0 : i32, i32
  }
  func.func @transform_16(%arg0: i32) -> (i32, i32) {
    %c0_i32 = arith.constant 0 : i32
    %c0_i32_0 = arith.constant 0 : i32
    %c0_i32_1 = arith.constant 0 : i32
    return %c0_i32, %c0_i32_0 : i32, i32
  }
  func.func @transform_17(%arg0: i32) -> (i32, i32, i32) {
    %c0_i32 = arith.constant 0 : i32
    %c0_i32_0 = arith.constant 0 : i32
    %c0_i32_1 = arith.constant 0 : i32
    return %arg0, %c0_i32, %c0_i32_0 : i32, i32, i32
  }
}

</mosaic_0001>

<bundles_post_ra>
// kernel: residual_attention_block.1
= control target key start
LH: loop header
LB: loop body
LE: loop exit
PB: predicated region body
PF: predicated region fallthrough
CT: control target
= control target key end

     0   :  { %s1661_s24 = smov 0   ;;  %s1991_s0 = inlined_call_operand.vmem [shape: f32[2,8,256], index: 0, kind: input, shape index: {}]   ;;  %s1992_s1 = inlined_call_operand.vmem [shape: bf16[8,72], index: 1, kind: input, shape index: {}]   ;;  %s1993_s2 = inlined_call_operand.vmem [shape: f32[8,1], index: 2, kind: input, shape index: {}]   ;;  %s1994_s3 = inlined_call_operand.vmem [shape: f32[8,1], index: 3, kind: input, shape index: {}]   ;;  %s1995_s4 = inlined_call_operand.vmem [shape: bf16[8,72], index: 4, kind: input, shape index: {}]   ;;  %s1996_s5 = inlined_call_operand.vmem [shape: f32[8,1], index: 5, kind: input, shape index: {}]   ;;  %s1997_s6 = inlined_call_operand.vmem [shape: f32[8,1], index: 6, kind: input, shape index: {}]   ;;  %s1998_s7 = inlined_call_operand.vmem [shape: f32[1,8], index: 7, kind: input, shape index: {}]   ;;  %s1999_s8 = inlined_call_operand.vmem [shape: f32[1,8], index: 8, kind: input, shape index: {}]   ;;  %s2000_s9 = inlined_call_operand.vmem [shape: f32[8,8], index: 9, kind: input, shape index: {}]   ;;  %s2001_s10 = inlined_call_operand.vmem [shape: f32[1,8], index: 10, kind: input, shape index: {}]   ;;  %s2002_s11 = inlined_call_operand.vmem [shape: f32[1,8], index: 11, kind: input, shape index: {}]   ;;  %s2003_s12 = inlined_call_operand.vmem [shape: f32[1,8], index: 12, kind: input, shape index: {}]   ;;  %s2004_s13 = inlined_call_operand.vmem [shape: f32[8,32], index: 13, kind: input, shape index: {}]   ;;  %s2005_s14 = inlined_call_operand.vmem [shape: f32[1,32], index: 14, kind: input, shape index: {}]   ;;  %s2006_s15 = inlined_call_operand.vmem [shape: f32[32,8], index: 15, kind: input, shape index: {}]   ;;  %s2007_s16 = inlined_call_operand.vmem [shape: f32[1,8], index: 16, kind: input, shape index: {}]   ;;  %s2008_s17 = inlined_call_operand.vmem [shape: f32[2,8,256], index: 17, kind: output, shape index: {}]  }
   0x1   :  { %2019 = sst [smem:[#allocation3_spill]] %s1991_s0 }
   0x2   :  { %2020 = sst [smem:[#allocation4_spill]] %s1992_s1 }
   0x3 LB: > { %s1335_s25 = sadd.s32 4294967295, %s1555_s24   ;;  %p1339_p0 = scmp.ge.s32.totalorder %s1555_s24, 1  ;;  %s1555_s24 = sphi %s1661_s24, %s27_s24  }
   0x4   : > { %p487_p1 = scmp.lt.s32.totalorder %s1555_s24, 3 }
   0x6   : > { %p488_p2 = pnand %p1339_p0, %p487_p1 }
   0x7   : > { %p539_p3 = scmp.lt.s32.totalorder (!%p488_p2), %s1335_s25, 1  ;;  %vm585_vm0 = vcmask (!%p488_p2), 277504   ;;  %v1557_v0 = vmov (!%p488_p2), 0.0   ;;  %s2021_s29 = sld [smem:[#allocation3_spill]] (!%p488_p2)  ;;  %vm598_vm1 = vcmask (!%p488_p2), 1047688   ;;  %vm593_vm2 = vcmask (!%p488_p2), 138240  }
   0x8   : > { %491 = sbr.rel (%p488_p2) target bundleno = 2735 (0xaaf), region = 88  ;;  %583 = vst [vmem:[#allocation2] sm:$0xff] (!%p488_p2), %v1557_v0  ;;  %586 = vst.msk [vmem:[#allocation2 + $0x10] sm:$0xff] (!%p488_p2), %vm585_vm0, %v1557_v0  ;;  %s1558_s30 = smov (!%p488_p2), 17   ;;  %v1567_v10 = vmov (!%p488_p2), 0   ;;  %v779_v11 = vld [vmem:[%s1993_s2] sm:$0xff] (!%p488_p2)  ;;  %v552_v15 = vlaneseq (!%p488_p2) }
   0x9   : > { %s1559_s18 = smov (!%p488_p2), 126   ;;  %s1560_s19 = smov (!%p488_p2), 127   ;;  %770 = vmatprep.mubr.bf16.mxu0 (!%p488_p2), %v1567_v10  ;;  %1501 = vset.pattern.permute.xlu0 (!%p488_p2), %v1567_v10  ;;  %v787_v12 = vld [vmem:[%s1994_s3] sm:$0xff] (!%p488_p2)  ;;  %vm2012_vm4 = vcmask (!%p488_p2), 1039360   ;;  %vm2010_vm6 = vcmask (!%p488_p2), 1031168   ;;  %vm1568_vm7 = vmmov (!%p488_p2), 1  }
   0xa   : > { %s1561_s1 = smov (!%p488_p2), 110   ;;  %s1562_s20 = smov (!%p488_p2), 112   ;;  %1502 = vset.pattern.permute.xlu1 (!%p488_p2), %v1567_v10  ;;  %960 = vmatprep.mubr.bf16.mxu1 (!%p488_p2), %v1567_v10  ;;  %v1727_v18 = vand.u32 (!%p488_p2), 127, %v552_v15  ;;  %vm2011_vm9 = vcmask (!%p488_p2), 916480   ;;  %vm2013_vm13 = vcmask (!%p488_p2), 900096   ;;  %vm2014_vm15 = vcmask (!%p488_p2), 908288  }
   0xb   : > { %s1563_s21 = smov (!%p488_p2), 96   ;;  %s1564_s22 = smov (!%p488_p2), 111   ;;  %v918_v40 = vld [vmem:[%s1995_s4] sm:$0xf] (!%p488_p2) }
   0xc   : > { %s1565_s23 = smov (!%p488_p2), 95   ;;  %s1566_s27 = smov (!%p488_p2), 94   ;;  %v554_v21 = vadd.s32 (!%p488_p2), 128, %v1727_v18  ;;  %v559_v25 = vand.u32 (!%p488_p2), 15, %v1727_v18 }
   0xe   : > { %v566_v24 = vand.u32 (!%p488_p2), 15, %v554_v21  ;;  %vm1739_vm5 = vcmp.ge.s32.totalorder (!%p488_p2), %v559_v25, 1  ;;  %vm1765_vm12 = vcmp.le.s32.totalorder (!%p488_p2), %v559_v25, 14 }
   0xf   : > { %s2058_s25 = smov (!%p539_p3, %s1335_s25), 1  ;;  %vm1756_vm10 = vmpackc.low %vm1568_vm7, %vm1739_vm5 }
  0x10   : > { %s2009_s26 = sshll.u32 %s2058_s25, 4  ;;  %vm1735_vm3 = vcmp.ge.s32.totalorder %v566_v24, 1  ;;  %vm1761_vm11 = vcmp.le.s32.totalorder %v566_v24, 14  ;;  %vm1353_vm0 = vmpackc.low %vm1739_vm5, %vm1765_vm12 }
  0x11   : > { %s543_s0 = scalar_lea.vmem %s2021_s29, %s2009_s26  ;;  %vm1747_vm8 = vmpackc.low %vm1568_vm7, %vm1735_vm3  ;;  %s2038_s29 = sld [smem:[#allocation4_spill]] }
  0x12   : > { %v1679_v1 = vld [vmem:[%s543_s0] sm:$0xff]  ;;  %v1683_v2 = vld [vmem:[%s543_s0 + $0x8] sm:$0xff]  ;;  %vm1350_vm14 = vmpackc.low %vm1735_vm3, %vm1761_vm11  ;;  %vm2049_vm3 = vcmask 777216  }
  0x13   : > { %589 = vrot.lane.b32.xlu0 %v1679_v1, %s1558_s30 }
  0x17   : > { %591 = vrot.lane.b32.xlu0 %v1683_v2, %s1558_s30 }
  0x85   : > { %v590_v3 = vpop.permute.xlu0 %589 }
  0x86   : > { %599 = vst.msk [vmem:[#allocation2] sm:$0xff] %vm598_vm1, %v590_v3 }
  0x89   : > { %v592_v4 = vpop.permute.xlu0 %591 }
  0x8a   : > { %601 = vst.msk [vmem:[#allocation2 + $0x10] sm:$0xff] %vm593_vm2, %v592_v4  ;;  %v1704_v7 = vsel %vm593_vm2, %v590_v3, %v592_v4 }
  0x8d   : > { %v1689_v5 = vld [vmem:[#allocation2] sm:$0xff] }
  0x8e   : > { %618 = vrot.lane.b32.xlu0 %v1689_v5, %s1559_s18  ;;  %683 = vrot.lane.b32.xlu1 %v1689_v5, %s1560_s19  ;;  %v1496_v9 = vpack.i.bf16 %v1704_v7, %v1689_v5 }
  0x91   : > { %v610_v6 = vld [vmem:[#allocation2 + $0x10] sm:$0xff] }
  0x92   : > { %644 = vrot.lane.b32.xlu0 %v1689_v5, %s1561_s1  ;;  %631 = vrot.lane.b32.xlu1 %v1689_v5, %s1562_s20  ;;  %v1466_v8 = vpack.i.bf16 %v610_v6, %v1704_v7 }
  0x96   : > { %657 = vrot.lane.b32.xlu0 %v1689_v5, %s1563_s21  ;;  %694 = vrot.lane.b32.xlu1 %v1689_v5, %s1564_s22 }
  0x9a   : > { %705 = vrot.lane.b32.xlu1 %v1689_v5, %s1565_s23  ;;  %1467 = vrot.lane.b32.xlu0 %v1466_v8, %s1559_s18 }
  0x9e   : > { %1477 = vrot.lane.b32.xlu0 %v1466_v8, %s1561_s1  ;;  %1462 = vrot.lane.b32.xlu1 %v1466_v8, %s1560_s19 }
  0xa2   : > { %1487 = vrot.lane.b32.xlu0 %v1466_v8, %s1563_s21  ;;  %1472 = vrot.lane.b32.xlu1 %v1466_v8, %s1562_s20 }
  0xa6   : > { %1497 = vrot.lane.b32.xlu0 %v1496_v9, %s1566_s27  ;;  %1482 = vrot.lane.b32.xlu1 %v1466_v8, %s1564_s22 }
  0xaa   : > { %1492 = vrot.lane.b32.xlu1 %v1466_v8, %s1565_s23  ;;  %782 = vperm.xlu0 %1501, %v779_v11  }
  0xae   : > { %674 = vrot.lane.b32.xlu1 %v610_v6, %s1566_s27 }
  0xb2   : > { %790 = vperm.xlu1 %1502, %v787_v12  }
 0x100   : > { %v684_v13 = vpop.permute.xlu1 %683  ;;  %v619_v14 = vpop.permute.xlu0 %618 }
 0x104   : > { %v632_v16 = vpop.permute.xlu1 %631  ;;  %v645_v17 = vpop.permute.xlu0 %644 }
 0x108   : > { %v695_v19 = vpop.permute.xlu1 %694  ;;  %v1729_v20 = vpop.permute.xlu0 %657 }
 0x10c   : > { %v1732_v22 = vpop.permute.xlu1 %705  ;;  %v1468_v23 = vpop.permute.xlu0 %1467 }
 0x10d   : > { %v1469_v32 = vunpack.i.l.bf16 %v1468_v23  ;;  %v1470_v33 = vunpack.i.h.bf16 %v1468_v23 }
 0x10f   : > { %v625_v46 = vsel %vm2010_vm6, %v619_v14, %v1469_v32  ;;  %v626_v48 = vsel %vm2010_vm6, %v1469_v32, %v1470_v33  ;;  %vm2015_vm6 = vcmask 769024  }
 0x110   : > { %v1463_v26 = vpop.permute.xlu1 %1462  ;;  %v1478_v27 = vpop.permute.xlu0 %1477 }
 0x111   : > { %v1465_v29 = vunpack.i.h.bf16 %v1463_v26  ;;  %v1464_v30 = vunpack.i.l.bf16 %v1463_v26  ;;  %v1479_v47 = vunpack.i.l.bf16 %v1478_v27  ;;  %v1480_v49 = vunpack.i.h.bf16 %v1478_v27 }
 0x113   : > { %v691_v34 = vsel %vm2012_vm4, %v1464_v30, %v1465_v29  ;;  %v690_v36 = vsel %vm2012_vm4, %v684_v13, %v1464_v30  ;;  %v651_v60 = vsel %vm2013_vm13, %v645_v17, %v1479_v47  ;;  %v652_v62 = vsel %vm2013_vm13, %v1479_v47, %v1480_v49  ;;  %vm1802_vm4 = vmpackc.low %vm1761_vm11, %vm1568_vm7  ;;  %v726_v29 = vld [vmem:[%s2038_s29] sm:$0xf] }
 0x114   : > { %v1473_v37 = vpop.permute.xlu1 %1472  ;;  %v1488_v38 = vpop.permute.xlu0 %1487  ;;  %v1345_v39 = vpack.c.bf16 %v691_v34, %v1704_v7  ;;  %v1348_v41 = vpack.c.bf16 %v690_v36, %v1689_v5  ;;  %vm2018_vm13 = vcmask 777216  }
 0x115   : > { %v1475_v43 = vunpack.i.h.bf16 %v1473_v37  ;;  %v1474_v44 = vunpack.i.l.bf16 %v1473_v37  ;;  %v1489_v61 = vunpack.i.l.bf16 %v1488_v38  ;;  %v1490_v63 = vunpack.i.h.bf16 %v1488_v38 }
 0x116   : > { %1346 = vmatprep.subr.msk.bf16.mxu0 %vm1747_vm8, %v1345_v39 }
 0x117   : > { %v638_v50 = vsel %vm2011_vm9, %v632_v16, %v1474_v44  ;;  %v639_v51 = vsel %vm2011_vm9, %v1474_v44, %v1475_v43  ;;  %1349 = vmatpush1.bf16.msk.msra.mxu0 %vm1756_vm10, %v1348_v41  ;;  %vm663_vm9 = vcmask 785408  }
 0x118   : > { %v1351_v52 = vpack.c.bf16 %v639_v51, %v626_v48  ;;  %v1354_v53 = vpack.c.bf16 %v638_v50, %v625_v46  ;;  %v1483_v54 = vpop.permute.xlu1 %1482  ;;  %v1498_v55 = vpop.permute.xlu0 %1497  ;;  %v664_v13 = vsel %vm663_vm9, %v1729_v20, %v1489_v61  ;;  %v665_v14 = vsel %vm663_vm9, %v1489_v61, %v1490_v63 }
 0x119   : > { %v1485_v56 = vunpack.i.h.bf16 %v1483_v54  ;;  %v1484_v57 = vunpack.i.l.bf16 %v1483_v54  ;;  %v1500_v58 = vunpack.i.h.bf16 %v1498_v55  ;;  %v1499_v59 = vunpack.i.l.bf16 %v1498_v55 }
 0x11a   : > { %1352 = vmatprep.subr.msk.bf16.mxu0 %vm1350_vm14, %v1351_v52 }
 0x11b   : > { %v701_v3 = vsel %vm2014_vm15, %v695_v19, %v1484_v57  ;;  %v702_v4 = vsel %vm2014_vm15, %v1484_v57, %v1485_v56  ;;  %1355 = vmatpush1.bf16.msk.msra.mxu0 %vm1353_vm0, %v1354_v53  ;;  %vm1809_vm15 = vmpackc.low %vm1765_vm12, %vm1568_vm7  ;;  %v677_v10 = vsel %vm2015_vm6, %v1499_v59, %v1500_v58  ;;  %vm2017_vm7 = vcmask 1043456  }
 0x11c   : > { %v1357_v6 = vpack.c.bf16 %v652_v62, %v702_v4  ;;  %v1360_v7 = vpack.c.bf16 %v651_v60, %v701_v3  ;;  %v1493_v8 = vpop.permute.xlu1 %1492  ;;  %v681_v19 = vsel %vm1765_vm12, %v677_v10, 0.0 }
 0x11d   : > { %v1495_v11 = vunpack.i.h.bf16 %v1493_v8  ;;  %v1494_v12 = vunpack.i.l.bf16 %v1493_v8 }
 0x11e   : > { %1358 = vmatprep.subr.msk.bf16.mxu0 %vm1802_vm4, %v1357_v6 }
 0x11f   : > { %v712_v16 = vsel %vm2018_vm13, %v1732_v22, %v1494_v12  ;;  %v713_v17 = vsel %vm2018_vm13, %v1494_v12, %v1495_v11  ;;  %1361 = vmatpush1.bf16.msk.msra.mxu0 %vm1809_vm15, %v1360_v7  ;;  %v724_v22 = vpack.c.bf16 %v681_v19, %v681_v19  ;;  %vm2043_vm13 = vcmask 916480  }
 0x120   : > { %v1363_v21 = vpack.c.bf16 %v713_v17, %v665_v14  ;;  %v1366_v23 = vpack.c.bf16 %v712_v16, %v664_v13  ;;  %v675_v24 = vpop.permute.xlu1 %674 }
 0x121   : > { %v678_v20 = vsel %vm2015_vm6, %v1500_v58, %v675_v24  ;;  %v733_v27 = vsel %vm2017_vm7, %v724_v22, 0  ;;  %vm2016_vm6 = vcmask 588800  }
 0x122   : > { %v682_v25 = vsel %vm1761_vm11, %v678_v20, 0.0  ;;  %1364 = vmatprep.subr.msk.bf16.mxu0 %vm1747_vm8, %v1363_v21 }
 0x123   : > { %v725_v26 = vpack.c.bf16 %v682_v25, %v682_v25  ;;  %1367 = vmatpush1.bf16.msk.msra.mxu0 %vm1756_vm10, %v1366_v23 }
 0x125   : > { %1368 = vmatprep.subr.msk.bf16.mxu0 %vm2017_vm7, %v725_v26 }
 0x127   : > { %747 = vmatpush1.bf16.msra.mxu0 %v733_v27 }
 0x129   : > { %v783_v30 = vpop.permute.xlu0 %782 }
 0x12a   : > { %1369 = vmatmul.mubr.msk.bf16.vlgmr.msra.gmra.mrb[0].mxu0 %vm2016_vm6, %v726_v29  ;;  %vm2041_vm6 = vcmask 1031168  }
 0x12b   : > { %vm2042_vm7 = vmmov %vm2041_vm6 }
 0x131   : > { %v791_v33 = vpop.permute.xlu1 %790 }
 0x1fd   : > { %v772_v32 = vpop.f32.mrb[0].mxu0 }
 0x1fe   : > { %v785_v34 = vmul.f32 %v783_v30, %v772_v32  ;;  %v774_v36 = vpop.f32.mrb[1].mxu0 }
 0x1ff   : > { %v786_v37 = vmul.f32 %v783_v30, %v774_v36  ;;  %v776_v38 = vpop.f32.mrb[2].mxu0 }
 0x200   : > { %v793_v39 = vadd.f32 %v791_v33, %v785_v34  ;;  %v777_v41 = vpop.f32.mrb[3].mxu0 }
 0x201   : > { %v794_v43 = vadd.f32 %v791_v33, %v786_v37 }
 0x202   : > { %v795_v44 = vmax.f32 %v793_v39, 0.0 }
 0x203   : > { %v796_v46 = vmax.f32 %v794_v43, 0.0 }
 0x204   : > { %799 = vrot.lane.b32.xlu1 %v795_v44, %s1558_s30 }
 0x205   : > { %801 = vrot.lane.b32.xlu0 %v796_v46, %s1558_s30 }
 0x276   : > { %v800_v47 = vpop.permute.xlu1 %799 }
 0x277   : > { %807 = vst.msk [vmem:[#allocation2] sm:$0xff] %vm598_vm1, %v800_v47  ;;  %v802_v48 = vpop.permute.xlu0 %801  ;;  %vm2039_vm1 = vcmask 1039360  }
 0x278   : > { %v803_v49 = vsel %vm593_vm2, %v800_v47, %v802_v48  ;;  %809 = vst.msk [vmem:[#allocation2 + $0x10] sm:$0xff] %vm593_vm2, %v802_v48  ;;  %vm2040_vm2 = vmmov %vm2039_vm1 }
 0x27e   : > { %v810_v50 = vld [vmem:[#allocation2] sm:$0xff] }
 0x27f   : > { %818 = vrot.lane.b32.xlu1 %v810_v50, %s1559_s18  ;;  %878 = vrot.lane.b32.xlu0 %v810_v50, %s1560_s19  ;;  %v814_v51 = vld [vmem:[#allocation2 + $0x10] sm:$0xff]  ;;  %v1538_v53 = vpack.i.bf16 %v803_v49, %v810_v50 }
 0x280   : > { %v1503_v52 = vpack.i.bf16 %v814_v51, %v803_v49 }
 0x283   : > { %842 = vrot.lane.b32.xlu1 %v810_v50, %s1561_s1  ;;  %830 = vrot.lane.b32.xlu0 %v810_v50, %s1562_s20 }
 0x287   : > { %854 = vrot.lane.b32.xlu1 %v810_v50, %s1563_s21  ;;  %888 = vrot.lane.b32.xlu0 %v810_v50, %s1564_s22 }
 0x28b   : > { %898 = vrot.lane.b32.xlu0 %v810_v50, %s1565_s23  ;;  %1504 = vrot.lane.b32.xlu1 %v1503_v52, %s1560_s19 }
 0x28f   : > { %1514 = vrot.lane.b32.xlu0 %v1503_v52, %s1562_s20  ;;  %1509 = vrot.lane.b32.xlu1 %v1503_v52, %s1559_s18 }
 0x293   : > { %1524 = vrot.lane.b32.xlu0 %v1503_v52, %s1564_s22  ;;  %1519 = vrot.lane.b32.xlu1 %v1503_v52, %s1561_s1  ;;  %s2056_s22 = sshll.u32 %s2058_s25, 4 }
 0x294   : > { %s548_s0 = scalar_lea.vmem %s2008_s17, %s2056_s22 }
 0x297   : > { %1534 = vrot.lane.b32.xlu0 %v1503_v52, %s1565_s23  ;;  %1529 = vrot.lane.b32.xlu1 %v1503_v52, %s1563_s21 }
 0x29b   : > { %870 = vrot.lane.b32.xlu0 %v814_v51, %s1566_s27  ;;  %1539 = vrot.lane.b32.xlu1 %v1538_v53, %s1566_s27 }
 0x2f1   : > { %v819_v54 = vpop.permute.xlu1 %818  ;;  %v879_v55 = vpop.permute.xlu0 %878 }
 0x2f5   : > { %v843_v56 = vpop.permute.xlu1 %842  ;;  %v831_v57 = vpop.permute.xlu0 %830 }
 0x2f9   : > { %v855_v58 = vpop.permute.xlu1 %854  ;;  %v889_v59 = vpop.permute.xlu0 %888 }
 0x2fd   : > { %v1505_v60 = vpop.permute.xlu1 %1504  ;;  %v899_v61 = vpop.permute.xlu0 %898 }
 0x2fe   : > { %v1507_v62 = vunpack.i.h.bf16 %v1505_v60  ;;  %v1506_v63 = vunpack.i.l.bf16 %v1505_v60 }
 0x300   : > { %v885_v3 = vsel %vm2039_vm1, %v1506_v63, %v1507_v62  ;;  %v884_v4 = vsel %vm2040_vm2, %v879_v55, %v1506_v63  ;;  %vm2044_vm1 = vmmov %vm2043_vm13  ;;  %v974_v62 = vld [vmem:[%s1996_s5] sm:$0xff] }
 0x301   : > { %v1510_v6 = vpop.permute.xlu1 %1509  ;;  %v1515_v7 = vpop.permute.xlu0 %1514  ;;  %v1371_v8 = vpack.c.bf16 %v885_v3, %v803_v49  ;;  %v1374_v10 = vpack.c.bf16 %v884_v4, %v810_v50  ;;  %v976_v4 = vld [vmem:[%s1997_s6] sm:$0xff] }
 0x302   : > { %v1512_v11 = vunpack.i.h.bf16 %v1510_v6  ;;  %v1511_v12 = vunpack.i.l.bf16 %v1510_v6  ;;  %v1517_v13 = vunpack.i.h.bf16 %v1515_v7  ;;  %v1516_v14 = vunpack.i.l.bf16 %v1515_v7 }
 0x303   : > { %1372 = vmatprep.subr.msk.bf16.mxu1 %vm1747_vm8, %v1371_v8  ;;  %v1916_v8 = vshrl.u32 %v552_v15, 7 }
 0x304   : > { %v824_v16 = vsel %vm2041_vm6, %v819_v54, %v1511_v12  ;;  %v825_v17 = vsel %vm2042_vm7, %v1511_v12, %v1512_v11  ;;  %v836_v19 = vsel %vm2043_vm13, %v831_v57, %v1516_v14  ;;  %v837_v21 = vsel %vm2044_vm1, %v1516_v14, %v1517_v13  ;;  %1375 = vmatpush1.bf16.msk.msra.mxu1 %vm1756_vm10, %v1374_v10 }
 0x305   : > { %v1377_v23 = vpack.c.bf16 %v837_v21, %v825_v17  ;;  %v1380_v24 = vpack.c.bf16 %v836_v19, %v824_v16  ;;  %v1520_v20 = vpop.permute.xlu1 %1519  ;;  %v1525_v25 = vpop.permute.xlu0 %1524  ;;  %vm2045_vm6 = vcmask 900096   ;;  %vm2047_vm7 = vcmask 908288  }
 0x306   : > { %v1522_v22 = vunpack.i.h.bf16 %v1520_v20  ;;  %v1521_v26 = vunpack.i.l.bf16 %v1520_v20  ;;  %v1527_v27 = vunpack.i.h.bf16 %v1525_v25  ;;  %v1526_v29 = vunpack.i.l.bf16 %v1525_v25  ;;  %vm2046_vm13 = vmmov %vm2045_vm6 }
 0x307   : > { %1378 = vmatprep.subr.msk.bf16.mxu1 %vm1350_vm14, %v1377_v23  ;;  %vm2048_vm2 = vmmov %vm2047_vm7  ;;  %vm1191_vm1 = vcmask 261120  }
 0x308   : > { %v848_v30 = vsel %vm2045_vm6, %v843_v56, %v1521_v26  ;;  %v849_v32 = vsel %vm2046_vm13, %v1521_v26, %v1522_v22  ;;  %v894_v33 = vsel %vm2047_vm7, %v889_v59, %v1526_v29  ;;  %v895_v34 = vsel %vm2048_vm2, %v1526_v29, %v1527_v27  ;;  %1381 = vmatpush1.bf16.msk.msra.mxu1 %vm1353_vm0, %v1380_v24  ;;  %vm2050_vm14 = vmmov %vm2049_vm3  ;;  %v1013_v26 = vld [vmem:[%s2000_s9] sm:$0xff] }
 0x309   : > { %v1383_v36 = vpack.c.bf16 %v849_v32, %v895_v34  ;;  %v1386_v28 = vpack.c.bf16 %v848_v30, %v894_v33  ;;  %v1530_v37 = vpop.permute.xlu1 %1529  ;;  %v1535_v38 = vpop.permute.xlu0 %1534  ;;  %v995_v33 = vld [vmem:[%s1998_s7] sm:$0x1]  ;;  %vm1090_vm0 = vcmask 57344  }
 0x30a   : > { %v1532_v39 = vunpack.i.h.bf16 %v1530_v37  ;;  %v1531_v41 = vunpack.i.l.bf16 %v1530_v37  ;;  %v1537_v43 = vunpack.i.h.bf16 %v1535_v38  ;;  %v1536_v44 = vunpack.i.l.bf16 %v1535_v38  ;;  %v1014_v38 = vld [vmem:[%s2001_s10] sm:$0x1] }
 0x30b   : > { %1384 = vmatprep.subr.msk.bf16.mxu1 %vm1802_vm4, %v1383_v36  ;;  %vm2051_vm4 = vcmask 769024   ;;  %v996_v36 = vld [vmem:[%s1999_s8] sm:$0x1] }
 0x30c   : > { %v860_v46 = vsel %vm663_vm9, %v855_v58, %v1531_v41  ;;  %v861_v47 = vsel %vm663_vm9, %v1531_v41, %v1532_v39  ;;  %v904_v31 = vsel %vm2049_vm3, %v899_v61, %v1536_v44  ;;  %v905_v48 = vsel %vm2050_vm14, %v1536_v44, %v1537_v43  ;;  %1387 = vmatpush1.bf16.msk.msra.mxu1 %vm1809_vm15, %v1386_v28  ;;  %vm2052_vm5 = vmmov %vm2051_vm4 }
 0x30d   : > { %v1389_v49 = vpack.c.bf16 %v905_v48, %v861_v47  ;;  %v1392_v50 = vpack.c.bf16 %v904_v31, %v860_v46  ;;  %v1540_v51 = vpop.permute.xlu1 %1539  ;;  %v871_v54 = vpop.permute.xlu0 %870  ;;  %vm2053_vm9 = vcmask 1043456  }
 0x30e   : > { %v1542_v52 = vunpack.i.h.bf16 %v1540_v51  ;;  %v1541_v53 = vunpack.i.l.bf16 %v1540_v51  ;;  %vm2054_vm15 = vmmov %vm2053_vm9 }
 0x30f   : > { %1390 = vmatprep.subr.msk.bf16.mxu1 %vm1747_vm8, %v1389_v49  ;;  %vm2055_vm8 = vcmask 588800  }
 0x310   : > { %v873_v5 = vsel %vm2051_vm4, %v1542_v52, %v871_v54  ;;  %1393 = vmatpush1.bf16.msk.msra.mxu1 %vm1756_vm10, %v1392_v50  ;;  %v872_v55 = vsel %vm2052_vm5, %v1541_v53, %v1542_v52  ;;  %vm980_vm10 = vcmp.eq.s32.totalorder %v1916_v8, %v1727_v18  ;;  %v1088_v54 = vld [vmem:[%s2002_s11] sm:$0x1] }
 0x311   : > { %v877_v9 = vsel %vm1761_vm11, %v873_v5, 0.0  ;;  %v876_v56 = vsel %vm1765_vm12, %v872_v55, 0.0  ;;  %vm987_vm11 = vcmask 64512   ;;  %vm1569_vm12 = vmmov 0   ;;  %v1089_v55 = vld [vmem:[%s2003_s12] sm:$0x1] }
 0x312   : > { %v917_v57 = vpack.c.bf16 %v877_v9, %v877_v9  ;;  %v916_v58 = vpack.c.bf16 %v876_v56, %v876_v56  ;;  %1430 = vmatprep.mubr.msk.f32.mxu0 %vm1569_vm12, %v1557_v0 }
 0x314   : > { %1394 = vmatprep.subr.msk.bf16.mxu1 %vm2053_vm9, %v917_v57  ;;  %v923_v35 = vsel %vm2054_vm15, %v916_v58, 0  ;;  %v1186_v57 = vld [vmem:[%s2006_s15] sm:$0xff]  ;;  %v1187_v58 = vld [vmem:[%s2006_s15 + $0x8] sm:$0xff] }
 0x315   : > { %937 = vmatpush1.bf16.msra.mxu1 %v923_v35  ;;  %v1434_v35 = vpack.c.bf16 %v1187_v58, %v1186_v57 }
 0x316   : > { %1412 = vmatprep.subr.mxu1 %v1557_v0 }
 0x318   : > { %1395 = vmatmul.mubr.msk.bf16.vlgmr.msra.gmra.mrb[0].mxu1 %vm2055_vm8, %v918_v40  ;;  %v1570_v40 = vmov 0.0|0.0  }
 0x319   : > { %1413 = vmatpush3.msra.mxu1 %v1013_v26  ;;  %1414 = vmatprep.mubr.msk.f32.mxu1 %vm1569_vm12, %v1557_v0 }
 0x31a   : > { %1417 = vmatprep.subr.mxu1 %v1557_v0  ;;  %1433 = vmatprep.subr.bf16.mxu0 %v1570_v40 }
 0x31b   : > { %1435 = vmatpush3.bf16.msra.mxu0 %v1434_v35 }
 0x31c   : > { %1436 = vmatprep.subr.bf16.mxu0 %v1570_v40 }
 0x3eb   : > { %v962_v42 = vpop.f32.mrb[0].mxu1 }
 0x3ec   : > { %v964_v59 = vpop.f32.mrb[1].mxu1 }
 0x3ed   : > { %v969_v60 = vadd.f32 %v964_v59, %v962_v42  ;;  %v966_v45 = vpop.f32.mrb[2].mxu1  ;;  %v1188_v42 = vld [vmem:[%s2006_s15 + $0x10] sm:$0xff]  ;;  %v1189_v59 = vld [vmem:[%s2006_s15 + $0x18] sm:$0xff] }
 0x3ee   : > { %v967_v61 = vpop.f32.mrb[3].mxu1  ;;  %v1107_v45 = vld [vmem:[%s2005_s14] sm:$0x1] }
 0x3ef   : > { %970 = vadd.xlane.f32.xlu1 %v969_v60  ;;  %v1437_v60 = vpack.c.bf16 %v1189_v59, %v1188_v42 }
 0x3f1   : > { %1438 = vmatpush3.bf16.msra.mxu0 %v1437_v60 }
 0x47c   : > { %v971_v63 = vpop.xlane.xlu1 %970 }
 0x47d   : > { %v973_v3 = vmul.f32 0.00390625, %v971_v63 }
 0x47f   : > { %v975_v6 = vmul.f32 %v974_v62, %v973_v3 }
 0x481   : > { %v977_v7 = vadd.f32 %v976_v4, %v975_v6 }
 0x483   : > { %983 = vperm.xlu0 %1501, %v977_v7  }
 0x502   : > { %v984_v10 = vpop.permute.xlu0 %983 }
 0x503   : > { %v986_v11 = vsel %vm980_vm10, %v984_v10, 0.0 }
 0x504   : > { %v988_v12 = vsel %vm987_vm11, %v986_v11, 0.0  ;;  %v1190_v11 = vld [vmem:[%s2007_s16] sm:$0x1] }
 0x505   : > { %v989_v13 = vrot.slane %v988_v12, 4 }
 0x507   : > { %v990_v14 = vadd.f32 %v989_v13, %v988_v12 }
 0x509   : > { %v991_v16 = vrot.slane %v990_v14, 2 }
 0x50b   : > { %v992_v17 = vadd.f32 %v991_v16, %v990_v14  ;;  %v1268_v16 = vsub.s32 0, %v1916_v8 }
 0x50d   : > { %v993_v19 = vrot.slane %v992_v17, 1 }
 0x50f   : > { %v1924_v21 = vadd.f32 %v993_v19, %v992_v17 }
 0x511   : > { %v997_v15 = vsel %vm987_vm11, %v1924_v21, 0.0 }
 0x512   : > { %998 = vadd.xlane.f32.xlu0 %v997_v15 }
 0x59f   : > { %v999_v23 = vpop.xlane.xlu0 %998 }
 0x5a0   : > { %v1001_v24 = vmul.f32 0.125, %v999_v23 }
 0x5a2   : > { %v1002_v20 = vsub.f32 %v1924_v21, %v1001_v24 }
 0x5a4   : > { %v1003_v25 = vmul.f32 %v1002_v20, %v1002_v20 }
 0x5a6   : > { %v1004_v22 = vsel %vm987_vm11, %v1003_v25, 0.0 }
 0x5a7   : > { %1005 = vadd.xlane.f32.xlu1 %v1004_v22 }
 0x634   : > { %v1006_v27 = vpop.xlane.xlu1 %1005 }
 0x635   : > { %v1007_v29 = vmul.f32 0.125, %v1006_v27 }
 0x637   : > { %v1008_v30 = vadd.f32 1e-05, %v1007_v29 }
 0x639   : > { %1543 = vrsqrt.f32 %v1008_v30 }
 0x643   : > { %v1544_v32 = vpop.eup %1543 }
 0x644   : > { %v1010_v34 = vmul.f32 %v1544_v32, %v1002_v20 }
 0x646   : > { %v1011_v28 = vmul.f32 %v1010_v34, %v995_v33 }
 0x648   : > { %v1012_v37 = vadd.f32 %v1011_v28, %v996_v36 }
 0x64a   : > { %1415 = vmatmul.mubr.msk.f32.vlgmr.msra.gmra.mrb[4].mxu1 %vm987_vm11, %v1012_v37 }
 0x64b   : > { %1419 = vmatprep.mubr.msk.f32.mxu1 %vm1569_vm12, %v1557_v0  ;;  %v1106_v0 = vld [vmem:[%s2004_s13] sm:$0xff] }
 0x64c   : > { %1418 = vmatpush3.msra.mxu1 %v1106_v0 }
 0x71d   : > { %v1084_v39 = vpop.f32.mrb[4].mxu1 }
 0x71e   : > { %v1085_v41 = vadd.f32 %v1084_v39, %v1014_v38  ;;  %v1416_v43 = vpop.f32.mrb[5].mxu1 }
 0x720   : > { %v1091_v44 = vsel %vm1090_vm0, %v1085_v41, 0.0 }
 0x721   : > { %1092 = vadd.xlane.f32.xlu0 %v1091_v44 }
 0x7ae   : > { %v1093_v46 = vpop.xlane.xlu0 %1092 }
 0x7af   : > { %v1094_v47 = vmul.f32 0.125, %v1093_v46 }
 0x7b1   : > { %v1095_v31 = vsub.f32 %v1085_v41, %v1094_v47 }
 0x7b3   : > { %v1096_v48 = vmul.f32 %v1095_v31, %v1095_v31 }
 0x7b5   : > { %v1097_v49 = vsel %vm1090_vm0, %v1096_v48, 0.0 }
 0x7b6   : > { %1098 = vadd.xlane.f32.xlu1 %v1097_v49 }
 0x843   : > { %v1099_v50 = vpop.xlane.xlu1 %1098 }
 0x844   : > { %v1100_v51 = vmul.f32 0.125, %v1099_v50 }
 0x846   : > { %v1101_v52 = vadd.f32 1e-05, %v1100_v51 }
 0x848   : > { %1545 = vrsqrt.f32 %v1101_v52 }
 0x852   : > { %v1546_v53 = vpop.eup %1545 }
 0x853   : > { %v1103_v5 = vmul.f32 %v1546_v53, %v1095_v31 }
 0x855   : > { %v1104_v9 = vmul.f32 %v1103_v5, %v1088_v54 }
 0x857   : > { %v1105_v56 = vadd.f32 %v1104_v9, %v1089_v55 }
 0x859   : > { %1420 = vmatmul.mubr.msk.f32.vlgmr.msra.gmra.mrb[6].mxu1 %vm987_vm11, %v1105_v56 }
 0x92c   : > { %v1177_v61 = vpop.f32.mrb[6].mxu1 }
 0x92d   : > { %v1178_v62 = vadd.f32 %v1177_v61, %v1107_v45  ;;  %v1421_v63 = vpop.f32.mrb[7].mxu1 }
 0x92f   : > { %v1182_v3 = vmul.f32 0.70710677, %v1178_v62  ;;  %v1181_v6 = vmul.f32 0.5, %v1178_v62 }
 0x931   : > { %1547 = verf.f32 %v1182_v3 }
 0x93b   : > { %v1548_v4 = vpop.eup %1547 }
 0x93c   : > { %v1184_v7 = vadd.f32 1.0, %v1548_v4 }
 0x93e   : > { %v1185_v10 = vmul.f32 %v1184_v7, %v1181_v6 }
 0x940   : > { %1431 = vmatmul.mubr.msk.f32.vlgmr.msra.gmra.mrb[4].mxu0 %vm1191_vm1, %v1185_v10 }
 0xa13   : > { %v1261_v12 = vpop.f32.mrb[4].mxu0 }
 0xa14   : > { %v1262_v13 = vadd.f32 %v1261_v12, %v1190_v11  ;;  %v1432_v14 = vpop.f32.mrb[5].mxu0 }
 0xa16   : > { %v1265_v17 = vadd.f32 %v1262_v13, %v1924_v21 }
 0xa18   : > { %v1269_v19 = vrot.slane %v1265_v17, %v1268_v16 }
 0xa1a   : > { %v1270_v15 = vsel %vm980_vm10, %v1269_v19, 0.0 }
 0xa1b   : > { %v1271_v23 = vsel %vm987_vm11, %v1270_v15, 0.0 }
 0xa1c   : > { %1272 = vadd.xlane.f32.xlu0 %v1271_v23 }
 0xaa9   : > { %v1273_v24 = vpop.xlane.xlu0 %1272 }
 0xaaa   : > { %v1274_v20 = vadd.f32 %v1273_v24, %v1679_v1  ;;  %v1275_v25 = vadd.f32 %v1273_v24, %v1683_v2 }
 0xaac   : > { %v1276_v22 = vmax.f32 %v1274_v20, 0.0  ;;  %v1277_v21 = vmax.f32 %v1275_v25, 0.0 }
 0xaae   : > { %1278 = vst [vmem:[%s548_s0] sm:$0xff] %v1276_v22  ;;  %1279 = vst [vmem:[%s548_s0 + $0x8] sm:$0xff] %v1277_v21 }
 0xaaf PF: > { %s27_s24 = sadd.s32 1, %s1555_s24  }
 0xab0   : > { %p24_p4 = scmp.ge.s32.totalorder %s27_s24, 4  }
 0xab2   :  { %26 = sbr.rel (!%p24_p4) target bundleno = 3 (0x3), region = 118 }

</bundles_post_ra>
